<compile_context>
chip_gen: v5e
topology: v5e:2x2
jax: 0.10.0
libtpu: 0.0.40
codegen_flags: <defaults>
</compile_context>

<pallas_src>
import functools

import jax
import jax.numpy as jnp
from jax.experimental import pallas as pl
from jax.experimental.pallas import tpu as pltpu


def _radiation_loss_kernel(pred_ref, tgt_ref, hpart_ref, cpart_ref,
                           hacc_ref, cacc_ref, *,
                           n_rows, row_tile, huber_delta):
    """One grid step: masked partial sums for `row_tile` rows of the flattened
    (B*2, (C/2)*H*W) layout (even rows = magnitude, odd rows = phase)."""
    shard = pl.program_id(0)
    step = pl.program_id(1)

    # ---- init accumulators on each shard's first step ----
    @pl.when(step == 0)
    def _():
        hacc_ref[...] = jnp.zeros_like(hacc_ref)
        cacc_ref[...] = jnp.zeros_like(cacc_ref)

    # Global row index of every sublane row in this tile (UNclamped: tiles past
    # the end re-read the last valid tile via the clamped index_map and are
    # zeroed by the validity mask below -> correct for any B).
    row0 = (shard * pl.num_programs(1) + step) * row_tile
    rows = row0 + jax.lax.broadcasted_iota(jnp.int32, (row_tile, 1), 0)
    valid = rows < n_rows
    is_mag = jnp.bitwise_and(rows, 1) == 0            # even row -> magnitude half
    mag_mask = jnp.logical_and(valid, is_mag)
    ph_mask = jnp.logical_and(valid, jnp.logical_not(is_mag))

    # Upcast to f32 in vregs only (narrow dtypes stay narrow in HBM/VMEM).
    d = pred_ref[...].astype(jnp.float32) - tgt_ref[...].astype(jnp.float32)
    ad = jnp.abs(d)

    # Huber (delta = huber_delta) elementwise term.
    huber = jnp.where(ad <= huber_delta,
                      0.5 * d * d,
                      huber_delta * (ad - 0.5 * huber_delta))
    # Circular loss elementwise term (cos is even, so sign of d is irrelevant).
    circ = 1.0 - jnp.cos(d)

    # Fold the (row_tile, L) partials to one lane-dense row before the
    # accumulator read-modify-write.  jnp.where is a select, so masked-off rows
    # (OOB garbage, possibly NaN/Inf) cannot leak into the sums.
    hacc_ref[...] += jnp.sum(jnp.where(mag_mask, huber, 0.0), axis=0, keepdims=True)
    cacc_ref[...] += jnp.sum(jnp.where(ph_mask, circ, 0.0), axis=0, keepdims=True)

    # ---- per-shard epilogue: single cross-lane reduce, write this core's own
    #      lane-dense partial-sum block (no cross-core race) ----
    @pl.when(step == pl.num_programs(1) - 1)
    def _():
        hpart_ref[...] = jnp.broadcast_to(jnp.sum(hacc_ref[...]), (1, 1, 128))
        cpart_ref[...] = jnp.broadcast_to(jnp.sum(cacc_ref[...]), (1, 1, 128))


def radiation_loss_dB(pred, target, *, mag_loss="huber", rad_phase_factor=1.0):
    """Pallas TPU equivalent of radiation_loss_dB.forward (huber magnitude loss)."""
    if mag_loss != "huber":
        # TODO(synk): 'combined' mode needs pytorch_msssim.MSSSIM (external dep).
        raise NotImplementedError("only mag_loss='huber' is implemented in Pallas")

    assert pred.shape == target.shape
    B, C, H, W = pred.shape
    assert C >= 2 and C % 2 == 0, "channels must split into equal mag/phase halves"
    ch_half = C // 2

    # ---- lane-dense flattening (free metadata reshape on contiguous NCHW) ----
    #   row 2*b   = magnitude channels of sample b, flattened
    #   row 2*b+1 = phase     channels of sample b, flattened
    L = ch_half * H * W
    R = B * 2
    pred2 = pred.reshape(R, L)
    tgt2 = target.reshape(R, L)

    # ---- tile sizing from the post-reshape padded footprint & real dtype ----
    itemsize = pred.dtype.itemsize
    lane_padded = -(-L // 128) * 128
    row_bytes = lane_padded * itemsize
    target_tile_bytes = 8 * 1024 * 1024     # per-input tile; good on v5e/v6e/v7x
    if R <= 8:
        row_tile = R                         # full extent satisfies the (8,128) rule
    else:
        rows_fit = max(8, (target_tile_bytes // row_bytes) // 8 * 8)
        row_tile = max(8, min(rows_fit, (R // 8) * 8))
    num_tiles = -(-R // row_tile)

    # Leading "parallel" axis: on v7x each TensorCore takes half the row tiles
    # and produces its own partial-sum block; a harmless no-op on v5e/v6e.
    num_shards = 2 if num_tiles >= 2 else 1
    tiles_per_shard = -(-num_tiles // num_shards)
    grid = (num_shards, tiles_per_shard)

    # Explicit VMEM limit: 2 inputs x 2 pipeline buffers x tile + accumulators,
    # above the 16/32 MiB scoped defaults, under every generation's physical
    # VMEM (64 MiB per TC on v7x).
    sub_padded = -(-row_tile // 8) * 8
    tile_bytes = sub_padded * row_bytes
    vmem_limit_bytes = int(min(48 * 1024 * 1024,
                               max(16 * 1024 * 1024,
                                   4 * tile_bytes + 4 * 1024 * 1024)))

    kernel = functools.partial(
        _radiation_loss_kernel,
        n_rows=R, row_tile=row_tile, huber_delta=1.0,
    )

    def in_map(s, i):
        # Clamp so a shard's trailing (fully out-of-range) steps re-read the
        # last valid tile; the kernel's row mask zeroes their contribution.
        return (jnp.minimum(s * tiles_per_shard + i, num_tiles - 1), 0)

    in_spec = pl.BlockSpec((row_tile, L), in_map)
    part_spec = pl.BlockSpec((1, 1, 128), lambda s, i: (s, 0, 0))

    hpart, cpart = pl.pallas_call(
        kernel,
        out_shape=(jax.ShapeDtypeStruct((num_shards, 1, 128), jnp.float32),
                   jax.ShapeDtypeStruct((num_shards, 1, 128), jnp.float32)),
        grid=grid,
        in_specs=[in_spec, in_spec],
        out_specs=(part_spec, part_spec),
        scratch_shapes=[
            pltpu.VMEM((1, L), jnp.float32),   # huber partial-sum accumulator
            pltpu.VMEM((1, L), jnp.float32),   # circular partial-sum accumulator
        ],
        compiler_params=pltpu.CompilerParams(
            dimension_semantics=("parallel", "arbitrary"),
            vmem_limit_bytes=vmem_limit_bytes,
        ),
    )(pred2, tgt2)

    # Tiny final combine in the wrapper (per-core partial sums -> scalar loss).
    n_half = float(B * ch_half * H * W)      # element count per half (mag == phase)
    hsum = jnp.sum(hpart[:, 0, 0])
    csum = jnp.sum(cpart[:, 0, 0])
    return hsum / n_half + rad_phase_factor * (csum / n_half)


def _reference_loss(pred, target, rad_phase_factor=1.0):
    """Pure-JAX reference for verification (matches the PyTorch module)."""
    pred = pred.astype(jnp.float32)
    target = target.astype(jnp.float32)
    C = pred.shape[1]
    Ch = C // 2
    pm, pp = pred[:, :Ch], pred[:, Ch:]
    tm, tp = target[:, :Ch], target[:, Ch:]
    d = pm - tm
    ad = jnp.abs(d)
    huber = jnp.mean(jnp.where(ad <= 1.0, 0.5 * d * d, ad - 0.5))
    circ = jnp.mean(1.0 - jnp.cos(pp - tp))
    return huber + rad_phase_factor * circ


if __name__ == "__main__":
    key = jax.random.PRNGKey(0)
    k1, k2 = jax.random.split(key)

    # Small shapes consistent with the forward: NCHW, even channel count.
    B, C, H, W = 2, 4, 16, 16
    pred = jax.random.normal(k1, (B, C, H, W), dtype=jnp.float32)
    target = jax.random.normal(k2, (B, C, H, W), dtype=jnp.float32)

    loss = radiation_loss_dB(pred, target, mag_loss="huber", rad_phase_factor=1.0)
    loss = jax.block_until_ready(loss)

    ref = _reference_loss(pred, target, rad_phase_factor=1.0)
    assert jnp.allclose(loss, ref, rtol=1e-5, atol=1e-5), (loss, ref)

    print("KERNEL_OK")
</pallas_src>

<mosaic_0001>
module attributes {stable_mosaic.version = 11 : i64} {
  func.func @_radiation_loss_kernel(%arg0: i32, %arg1: i32, %arg2: memref<4x512xf32, #tpu.memory_space<vmem>>, %arg3: memref<4x512xf32, #tpu.memory_space<vmem>>, %arg4: memref<1x1x128xf32, #tpu.memory_space<vmem>>, %arg5: memref<1x1x128xf32, #tpu.memory_space<vmem>>, %arg6: memref<1x512xf32, #tpu.memory_space<vmem>>, %arg7: memref<1x512xf32, #tpu.memory_space<vmem>>) attributes {dimension_semantics = [#tpu.dimension_semantics<parallel>, #tpu.dimension_semantics<arbitrary>], iteration_bounds = array<i64: 1, 1>, scalar_prefetch = 0 : i64, scratch_operands = 2 : i64, tpu.core_type = #tpu.core_type<tc>, window_params = [{transform_indices = @transform_0, window_bounds = array<i64: 4, 512>}, {transform_indices = @transform_1, window_bounds = array<i64: 4, 512>}, {transform_indices = @transform_2, window_bounds = array<i64: 1, 1, 128>}, {transform_indices = @transform_3, window_bounds = array<i64: 1, 1, 128>}]} {
    %c0_i32 = arith.constant 0 : i32
    %0 = arith.cmpi eq, %arg1, %c0_i32 : i32
    %1 = arith.extui %0 : i1 to i32
    %c0_i32_0 = arith.constant 0 : i32
    %2 = arith.cmpi ne, %1, %c0_i32_0 : i32
    scf.if %2 {
      %cst_26 = arith.constant 0.000000e+00 : f32
      %56 = vector.broadcast %cst_26 : f32 to vector<1x512xf32>
      %c0_27 = arith.constant 0 : index
      %c0_28 = arith.constant 0 : index
      %57 = vector.load %arg6[%c0_27, %c0_28] : memref<1x512xf32, #tpu.memory_space<vmem>>, vector<1x512xf32>
      tpu.vector_store %arg6[%c0_27, %c0_28], %56 {strides = array<i32>} : memref<1x512xf32, #tpu.memory_space<vmem>>, vector<1x512xf32>,
      %cst_29 = arith.constant 0.000000e+00 : f32
      %58 = vector.broadcast %cst_29 : f32 to vector<1x512xf32>
      %c0_30 = arith.constant 0 : index
      %c0_31 = arith.constant 0 : index
      %59 = vector.load %arg7[%c0_30, %c0_31] : memref<1x512xf32, #tpu.memory_space<vmem>>, vector<1x512xf32>
      tpu.vector_store %arg7[%c0_30, %c0_31], %58 {strides = array<i32>} : memref<1x512xf32, #tpu.memory_space<vmem>>, vector<1x512xf32>,
    } else {
    }
    %c1_i32 = arith.constant 1 : i32
    %3 = arith.muli %arg0, %c1_i32 : i32
    %4 = arith.addi %3, %arg1 : i32
    %c4_i32 = arith.constant 4 : i32
    %5 = arith.muli %4, %c4_i32 : i32
    %6 = tpu.iota {dimensions = array<i32: 0>} : vector<4x1xi32>
    %7 = vector.broadcast %5 : i32 to vector<4x1xi32>
    %8 = arith.addi %7, %6 : vector<4x1xi32>
    %c4_i32_1 = arith.constant 4 : i32
    %9 = vector.broadcast %c4_i32_1 : i32 to vector<4x1xi32>
    %10 = arith.cmpi slt, %8, %9 : vector<4x1xi32>
    %c1_i32_2 = arith.constant 1 : i32
    %11 = vector.broadcast %c1_i32_2 : i32 to vector<4x1xi32>
    %12 = arith.andi %8, %11 : vector<4x1xi32>
    %c0_i32_3 = arith.constant 0 : i32
    %13 = vector.broadcast %c0_i32_3 : i32 to vector<4x1xi32>
    %14 = arith.cmpi eq, %12, %13 : vector<4x1xi32>
    %15 = arith.andi %10, %14 : vector<4x1xi1>
    %cst = arith.constant dense<true> : vector<4x1xi1>
    %16 = arith.xori %14, %cst : vector<4x1xi1>
    %17 = arith.andi %10, %16 : vector<4x1xi1>
    %c0 = arith.constant 0 : index
    %c0_4 = arith.constant 0 : index
    %18 = vector.load %arg2[%c0, %c0_4] : memref<4x512xf32, #tpu.memory_space<vmem>>, vector<4x512xf32>
    %c0_5 = arith.constant 0 : index
    %c0_6 = arith.constant 0 : index
    %19 = vector.load %arg3[%c0_5, %c0_6] : memref<4x512xf32, #tpu.memory_space<vmem>>, vector<4x512xf32>
    %20 = arith.subf %18, %19 : vector<4x512xf32>
    %21 = math.absf %20 : vector<4x512xf32>
    %cst_7 = arith.constant 1.000000e+00 : f32
    %22 = vector.broadcast %cst_7 : f32 to vector<4x512xf32>
    %23 = arith.cmpf ole, %21, %22 : vector<4x512xf32>
    %cst_8 = arith.constant 5.000000e-01 : f32
    %24 = vector.broadcast %cst_8 : f32 to vector<4x512xf32>
    %25 = arith.mulf %24, %20 : vector<4x512xf32>
    %26 = arith.mulf %25, %20 : vector<4x512xf32>
    %cst_9 = arith.constant 5.000000e-01 : f32
    %27 = vector.broadcast %cst_9 : f32 to vector<4x512xf32>
    %28 = arith.subf %21, %27 : vector<4x512xf32>
    %cst_10 = arith.constant 1.000000e+00 : f32
    %29 = vector.broadcast %cst_10 : f32 to vector<4x512xf32>
    %30 = arith.mulf %29, %28 : vector<4x512xf32>
    %31 = arith.select %23, %26, %30 : vector<4x512xi1>, vector<4x512xf32>
    %32 = math.cos %20 : vector<4x512xf32>
    %cst_11 = arith.constant 1.000000e+00 : f32
    %33 = vector.broadcast %cst_11 : f32 to vector<4x512xf32>
    %34 = arith.subf %33, %32 : vector<4x512xf32>
    %c0_12 = arith.constant 0 : index
    %c0_13 = arith.constant 0 : index
    %35 = vector.load %arg6[%c0_12, %c0_13] : memref<1x512xf32, #tpu.memory_space<vmem>>, vector<1x512xf32>
    %cst_14 = arith.constant 0.000000e+00 : f32
    %36 = vector.shape_cast %15 : vector<4x1xi1> to vector<4x1xi1>
    %37 = vector.broadcast %36 : vector<4x1xi1> to vector<4x512xi1>
    %38 = vector.broadcast %cst_14 : f32 to vector<4x512xf32>
    %39 = arith.select %37, %31, %38 : vector<4x512xi1>, vector<4x512xf32>
    %cst_15 = arith.constant dense<0.000000e+00> : vector<512xf32>
    %40 = vector.multi_reduction <add>, %39, %cst_15 [0] : vector<4x512xf32> to vector<512xf32>
    %41 = vector.shape_cast %40 : vector<512xf32> to vector<1x512xf32>
    %42 = arith.addf %35, %41 : vector<1x512xf32>
    %c0_16 = arith.constant 0 : index
    %c0_17 = arith.constant 0 : index
    %43 = vector.load %arg6[%c0_16, %c0_17] : memref<1x512xf32, #tpu.memory_space<vmem>>, vector<1x512xf32>
    tpu.vector_store %arg6[%c0_16, %c0_17], %42 {strides = array<i32>} : memref<1x512xf32, #tpu.memory_space<vmem>>, vector<1x512xf32>,
    %c0_18 = arith.constant 0 : index
    %c0_19 = arith.constant 0 : index
    %44 = vector.load %arg7[%c0_18, %c0_19] : memref<1x512xf32, #tpu.memory_space<vmem>>, vector<1x512xf32>
    %cst_20 = arith.constant 0.000000e+00 : f32
    %45 = vector.shape_cast %17 : vector<4x1xi1> to vector<4x1xi1>
    %46 = vector.broadcast %45 : vector<4x1xi1> to vector<4x512xi1>
    %47 = vector.broadcast %cst_20 : f32 to vector<4x512xf32>
    %48 = arith.select %46, %34, %47 : vector<4x512xi1>, vector<4x512xf32>
    %cst_21 = arith.constant dense<0.000000e+00> : vector<512xf32>
    %49 = vector.multi_reduction <add>, %48, %cst_21 [0] : vector<4x512xf32> to vector<512xf32>
    %50 = vector.shape_cast %49 : vector<512xf32> to vector<1x512xf32>
    %51 = arith.addf %44, %50 : vector<1x512xf32>
    %c0_22 = arith.constant 0 : index
    %c0_23 = arith.constant 0 : index
    %52 = vector.load %arg7[%c0_22, %c0_23] : memref<1x512xf32, #tpu.memory_space<vmem>>, vector<1x512xf32>
    tpu.vector_store %arg7[%c0_22, %c0_23], %51 {strides = array<i32>} : memref<1x512xf32, #tpu.memory_space<vmem>>, vector<1x512xf32>,
    %c0_i32_24 = arith.constant 0 : i32
    %53 = arith.cmpi eq, %arg1, %c0_i32_24 : i32
    %54 = arith.extui %53 : i1 to i32
    %c0_i32_25 = arith.constant 0 : i32
    %55 = arith.cmpi ne, %54, %c0_i32_25 : i32
    scf.if %55 {
      %c0_26 = arith.constant 0 : index
      %c0_27 = arith.constant 0 : index
      %56 = vector.load %arg6[%c0_26, %c0_27] : memref<1x512xf32, #tpu.memory_space<vmem>>, vector<1x512xf32>
      %57 = vector.shape_cast %56 : vector<1x512xf32> to vector<1x1x512xf32>
      %cst_28 = arith.constant dense<0.000000e+00> : vector<1xf32>
      %58 = vector.multi_reduction <add>, %57, %cst_28 [1, 2] : vector<1x1x512xf32> to vector<1xf32>
      %59 = vector.shape_cast %58 : vector<1xf32> to vector<1x1x1xf32>
      %60 = vector.extract %59[0, 0, 0] : f32 from vector<1x1x1xf32>
      %61 = vector.broadcast %60 : f32 to vector<1x1x128xf32>
      %c0_29 = arith.constant 0 : index
      %c0_30 = arith.constant 0 : index
      %c0_31 = arith.constant 0 : index
      %62 = vector.load %arg4[%c0_29, %c0_30, %c0_31] : memref<1x1x128xf32, #tpu.memory_space<vmem>>, vector<1x1x128xf32>
      tpu.vector_store %arg4[%c0_29, %c0_30, %c0_31], %61 {strides = array<i32>} : memref<1x1x128xf32, #tpu.memory_space<vmem>>, vector<1x1x128xf32>,
      %c0_32 = arith.constant 0 : index
      %c0_33 = arith.constant 0 : index
      %63 = vector.load %arg7[%c0_32, %c0_33] : memref<1x512xf32, #tpu.memory_space<vmem>>, vector<1x512xf32>
      %64 = vector.shape_cast %63 : vector<1x512xf32> to vector<1x1x512xf32>
      %cst_34 = arith.constant dense<0.000000e+00> : vector<1xf32>
      %65 = vector.multi_reduction <add>, %64, %cst_34 [1, 2] : vector<1x1x512xf32> to vector<1xf32>
      %66 = vector.shape_cast %65 : vector<1xf32> to vector<1x1x1xf32>
      %67 = vector.extract %66[0, 0, 0] : f32 from vector<1x1x1xf32>
      %68 = vector.broadcast %67 : f32 to vector<1x1x128xf32>
      %c0_35 = arith.constant 0 : index
      %c0_36 = arith.constant 0 : index
      %c0_37 = arith.constant 0 : index
      %69 = vector.load %arg5[%c0_35, %c0_36, %c0_37] : memref<1x1x128xf32, #tpu.memory_space<vmem>>, vector<1x1x128xf32>
      tpu.vector_store %arg5[%c0_35, %c0_36, %c0_37], %68 {strides = array<i32>} : memref<1x1x128xf32, #tpu.memory_space<vmem>>, vector<1x1x128xf32>,
    } else {
    }
    return
  }
  func.func @transform_0(%arg0: i32, %arg1: i32) -> (i32, i32) {
    %c1_i32 = arith.constant 1 : i32
    %0 = arith.muli %arg0, %c1_i32 : i32
    %1 = arith.addi %0, %arg1 : i32
    %c0_i32 = arith.constant 0 : i32
    %2 = arith.minsi %1, %c0_i32 : i32
    %c0_i32_0 = arith.constant 0 : i32
    %c0_i32_1 = arith.constant 0 : i32
    return %2, %c0_i32_0 : i32, i32
  }
  func.func @transform_1(%arg0: i32, %arg1: i32) -> (i32, i32) {
    %c1_i32 = arith.constant 1 : i32
    %0 = arith.muli %arg0, %c1_i32 : i32
    %1 = arith.addi %0, %arg1 : i32
    %c0_i32 = arith.constant 0 : i32
    %2 = arith.minsi %1, %c0_i32 : i32
    %c0_i32_0 = arith.constant 0 : i32
    %c0_i32_1 = arith.constant 0 : i32
    return %2, %c0_i32_0 : i32, i32
  }
  func.func @transform_2(%arg0: i32, %arg1: i32) -> (i32, i32, i32) {
    %c0_i32 = arith.constant 0 : i32
    %c0_i32_0 = arith.constant 0 : i32
    %c0_i32_1 = arith.constant 0 : i32
    return %arg0, %c0_i32, %c0_i32_0 : i32, i32, i32
  }
  func.func @transform_3(%arg0: i32, %arg1: i32) -> (i32, i32, i32) {
    %c0_i32 = arith.constant 0 : i32
    %c0_i32_0 = arith.constant 0 : i32
    %c0_i32_1 = arith.constant 0 : i32
    return %arg0, %c0_i32, %c0_i32_0 : i32, i32, i32
  }
}

</mosaic_0001>

<bundles_post_ra>
// kernel: tpu_custom_call.1
= control target key start
LH: loop header
LB: loop body
LE: loop exit
PB: predicated region body
PF: predicated region fallthrough
CT: control target
= control target key end

     0   :  { %9 = vsyncpa [#allocation5], 0  ;;  %s1068_s0 = inlined_call_operand.hbm [shape: f32[4,512], index: 0, kind: input, shape index: {}]   ;;  %s1069_s1 = inlined_call_operand.hbm [shape: f32[4,512], index: 1, kind: input, shape index: {}]   ;;  %s1070_s2 = inlined_call_operand.hbm [shape: f32[1,1,128], index: 2, kind: output, shape index: {0}]   ;;  %s1071_s3 = inlined_call_operand.hbm [shape: f32[1,1,128], index: 3, kind: output, shape index: {1}]  }
   0x1   :  { %10 = vsyncpa [#allocation8], 0 }
   0x2   :  { %11 = vsyncpa [#allocation6], 0 }
   0x3   :  { %12 = vsyncpa [#allocation11], 0  ;;  %s24_s14 = sshll.u32 %s1068_s0, 4  ;;  %s767_s15 = smov [#allocation4]   ;;  %s25_s14 = int_to_ptr.hbm [resolvable:$true] %s24_s14 }
   0x4   :  { %s26_s16 = sshll.u32 %s767_s15, 4  ;;  %s41_s19 = sshll.u32 %s1069_s1, 4  ;;  %s27_s16 = int_to_ptr.vmem [resolvable:$true] %s26_s16  ;;  %s42_s19 = int_to_ptr.hbm [resolvable:$true] %s41_s19 }
   0x5   :  { %29 = dma.hbm_to_vmem [thread:$0]  %s25_s14, 256, %s27_s16, [#allocation5]  }
   0x6   :  { %s768_s20 = smov [#allocation7]  }
   0x7   :  { %s43_s21 = sshll.u32 %s768_s20, 4  ;;  %s44_s21 = int_to_ptr.vmem [resolvable:$true] %s43_s21 }
   0x8   :  { %46 = dma.hbm_to_vmem [thread:$0]  %s42_s19, 256, %s44_s21, [#allocation8]  }
   0x9   :  { %759 = dma.done.wait [#allocation5], 256  }
   0xa   :  { %760 = vsyncadd [#allocation5], 4294967040 }
   0xb   :  { %761 = dma.done.wait [#allocation8], 256  }
   0xc   :  { %762 = vsyncadd [#allocation8], 4294967040  ;;  %v65_v0 = vlaneseq  ;;  %v769_v2 = vmov 0.0   ;;  %v83_v3 = vld [vmem:[#allocation4] sm:$0xff]  ;;  %v84_v4 = vld [vmem:[#allocation4 + $0x8] sm:$0xff]  ;;  %s778_s0 = smov [#allocation9]  }
   0xd   :  { %v85_v5 = vld [vmem:[#allocation7] sm:$0xff]  ;;  %v86_v6 = vld [vmem:[#allocation7 + $0x8] sm:$0xff]  ;;  %v770_v38 = vmov 683565275   ;;  %v771_v40 = vmov 2475754826  }
   0xe   :  { %vm807_vm0 = vcmp.lt.s32.totalorder %v65_v0, 512  ;;  %v815_v7 = vsub.f32 %v83_v3, %v85_v5  ;;  %v817_v8 = vsub.f32 %v84_v4, %v86_v6  ;;  %v772_v42 = vmov 2131351028   ;;  %s605_s1 = sshll.u32 %s778_s0, 4  ;;  %s607_s24 = sshll.u32 %s1070_s2, 4  ;;  %s606_s1 = int_to_ptr.vmem [resolvable:$true] %s605_s1  ;;  %s608_s24 = int_to_ptr.hbm [resolvable:$true] %s607_s24 }
   0xf   :  { %69 = vst.msk [vmem:[#allocation2] sm:$0xf] %vm807_vm0, %v769_v2  ;;  %v773_v44 = vmov 2102212464   ;;  %v774_v46 = vmov 920167782  }
  0x10   :  { %70 = vst.msk [vmem:[#allocation3] sm:$0xf] %vm807_vm0, %v769_v2  ;;  %v820_v9 = vand.u32 2147483647, %v815_v7  ;;  %v823_v10 = vand.u32 2147483647, %v817_v8 }
  0x11   :  { %v93_v11 = vmul.f32 0.5, %v815_v7  ;;  %v94_v12 = vmul.f32 0.5, %v817_v8  ;;  %v104_v13 = vand.u32 2139095040, %v815_v7  ;;  %v258_v14 = vand.u32 2139095040, %v817_v8  ;;  %s779_s26 = smov [#allocation10]   ;;  %s618_s30 = sshll.u32 %s1071_s3, 4  ;;  %s619_s30 = int_to_ptr.hbm [resolvable:$true] %s618_s30 }
  0x12   :  { %vm91_vm1 = vcmp.le.f32.partialorder %v820_v9, 1.0  ;;  %vm92_vm2 = vcmp.le.f32.partialorder %v823_v10, 1.0  ;;  %v638_v17 = vadd.f32 -0.5, %v820_v9  ;;  %v639_v18 = vadd.f32 -0.5, %v823_v10  ;;  %s616_s27 = sshll.u32 %s779_s26, 4  ;;  %s617_s27 = int_to_ptr.vmem [resolvable:$true] %s616_s27 }
  0x13   :  { %v95_v15 = vmul.f32 %v93_v11, %v815_v7  ;;  %v96_v16 = vmul.f32 %v94_v12, %v817_v8  ;;  %v105_v19 = vshrl.u32 %v104_v13, 23  ;;  %v108_v20 = vand.u32 8388607, %v820_v9 }
  0x14   :  { %v259_v21 = vshrl.u32 %v258_v14, 23  ;;  %v262_v27 = vand.u32 8388607, %v823_v10  ;;  %v775_v55 = vmov 1326507024  }
  0x15   :  { %v99_v22 = vsel %vm91_vm1, %v95_v15, %v638_v17  ;;  %v100_v23 = vsel %vm92_vm2, %v96_v16, %v639_v18  ;;  %v640_v24 = vadd.s32 4294967169, %v105_v19  ;;  %v109_v25 = vor.u32 8388608, %v108_v20 }
  0x16   :  { %v643_v26 = vadd.s32 4294967169, %v259_v21  ;;  %416 = vst [vmem:[#allocation1] ss:$2 sm:$0xff] %v99_v22  ;;  %v263_v32 = vor.u32 8388608, %v262_v27 }
  0x17   :  { %v111_v28 = vadd.s32 1, %v640_v24  ;;  %418 = vst [vmem:[#allocation1 + $0x10] ss:$2 sm:$0xff] %v100_v23  ;;  %v837_v31 = vshll.u32 %v109_v25, 8 }
  0x18   :  { %v265_v29 = vadd.s32 1, %v643_v26  ;;  %v847_v49 = vshll.u32 %v263_v32, 8 }
  0x19   :  { %vm112_vm3 = vcmp.gt.s32.totalorder %v111_v28, 0  ;;  %v150_v48 = vand.u32 65535, %v837_v31  ;;  %v151_v53 = vshrl.u32 %v837_v31, 16 }
  0x1a   :  { %v113_v30 = vsel %vm112_vm3, %v111_v28, 0  ;;  %vm266_vm4 = vcmp.gt.s32.totalorder %v265_v29, 0 }
  0x1b   :  { %v115_v33 = vand.u32 31, %v113_v30  ;;  %v267_v34 = vsel %vm266_vm4, %v265_v29, 0  ;;  %v839_v35 = vshrl.u32 %v113_v30, 5 }
  0x1c   :  { %v841_v36 = vand.u32 31, %v267_v34  ;;  %v865_v4 = vshrl.u32 %v267_v34, 5 }
  0x1d   :  { %v116_v37 = vsub.s32 32, %v115_v33  ;;  %v118_v39 = vshll.u32 %v770_v38, %v115_v33  ;;  %v121_v41 = vshll.u32 %v771_v40, %v115_v33  ;;  %v124_v43 = vshll.u32 %v772_v42, %v115_v33 }
  0x1e   :  { %v127_v45 = vshll.u32 %v773_v44, %v115_v33  ;;  %v130_v47 = vshll.u32 %v774_v46, %v115_v33  ;;  %vm133_vm5 = vcmp.lt.s32.totalorder %v839_v35, 1  ;;  %vm136_vm6 = vcmp.lt.s32.totalorder %v839_v35, 4 }
  0x1f   :  { %v119_v50 = vshrl.u32 %v771_v40, %v116_v37  ;;  %v122_v51 = vshrl.u32 %v772_v42, %v116_v37  ;;  %v125_v52 = vshrl.u32 %v773_v44, %v116_v37  ;;  %v128_v54 = vshrl.u32 %v774_v46, %v116_v37 }
  0x20   :  { %v131_v56 = vshrl.u32 %v775_v55, %v116_v37  ;;  %v856_v60 = vsub.s32 32, %v841_v36  ;;  %v117_v61 = vshrl.u32 %v770_v38, %v116_v37  ;;  %vm135_vm7 = vcmp.lt.s32.totalorder %v839_v35, 3 }
  0x21   :  { %v120_v57 = vor.u32 %v119_v50, %v118_v39  ;;  %v123_v58 = vor.u32 %v122_v51, %v121_v41  ;;  %v126_v59 = vor.u32 %v125_v52, %v124_v43  ;;  %v129_v62 = vor.u32 %v128_v54, %v127_v45 }
  0x22   :  { %v132_v63 = vor.u32 %v131_v56, %v130_v47  ;;  %vm134_vm8 = vcmp.lt.s32.totalorder %v839_v35, 2  ;;  %v272_v11 = vshll.u32 %v770_v38, %v841_v36  ;;  %v275_v12 = vshll.u32 %v771_v40, %v841_v36 }
  0x23   :  { %v141_v2 = vsel %vm133_vm5, %v120_v57, %v123_v58  ;;  %v145_v3 = vsel %vm133_vm5, %v123_v58, %v126_v59  ;;  %v142_v5 = vsel %vm136_vm6, %v129_v62, 920167782  ;;  %v138_v13 = vsel %vm136_vm6, %v126_v59, 2102212464 }
  0x24   :  { %v146_v6 = vsel %vm136_vm6, %v132_v63, 1326507024  ;;  %v143_v14 = vsel %vm135_vm7, %v126_v59, %v142_v5  ;;  %v273_v16 = vshrl.u32 %v771_v40, %v856_v60  ;;  %v137_v17 = vsel %vm133_vm5, %v117_v61, %v120_v57 }
  0x25   :  { %v147_v15 = vsel %vm135_vm7, %v129_v62, %v146_v6  ;;  %v144_v18 = vsel %vm134_vm8, %v141_v2, %v143_v14  ;;  %v276_v20 = vshrl.u32 %v772_v42, %v856_v60  ;;  %v139_v25 = vsel %vm135_vm7, %v123_v58, %v138_v13 }
  0x26   :  { %v148_v19 = vsel %vm134_vm8, %v145_v3, %v147_v15  ;;  %v174_v23 = vand.u32 65535, %v144_v18  ;;  %v175_v24 = vshrl.u32 %v144_v18, 16  ;;  %v890_v26 = vor.u32 %v273_v16, %v272_v11 }
  0x27   :  { %v152_v21 = vand.u32 65535, %v148_v19  ;;  %v153_v22 = vshrl.u32 %v148_v19, 16  ;;  %v892_v27 = vor.u32 %v276_v20, %v275_v12  ;;  %v278_v28 = vshll.u32 %v772_v42, %v841_v36 }
  0x28   :  { %v279_v33 = vshrl.u32 %v773_v44, %v856_v60  ;;  %v176_v37 = vmul.u32 %v174_v23, %v150_v48  ;;  %v177_v39 = vmul.u32 %v175_v24, %v150_v48  ;;  %v178_v40 = vmul.u32 %v174_v23, %v151_v53 }
  0x29   :  { %v154_v29 = vmul.u32 %v152_v21, %v150_v48  ;;  %v155_v30 = vmul.u32 %v153_v22, %v150_v48  ;;  %v156_v32 = vmul.u32 %v152_v21, %v151_v53  ;;  %v157_v34 = vmul.u32 %v153_v22, %v151_v53 }
  0x2a   :  { %v179_v47 = vmul.u32 %v175_v24, %v151_v53  ;;  %v180_v51 = vshll.u32 %v177_v39, 16  ;;  %v181_v52 = vshrl.u32 %v177_v39, 16  ;;  %v182_v54 = vshll.u32 %v178_v40, 16 }
  0x2b   :  { %v158_v41 = vshll.u32 %v155_v30, 16  ;;  %v159_v43 = vshrl.u32 %v155_v30, 16  ;;  %v160_v45 = vshll.u32 %v156_v32, 16  ;;  %v161_v50 = vshrl.u32 %v156_v32, 16 }
  0x2c   :  { %v183_v56 = vshrl.u32 %v178_v40, 16  ;;  %v281_v57 = vshll.u32 %v773_v44, %v841_v36  ;;  %v776_v58 = vmov 0   ;;  %vm184_vm10 = vc.u32 %v176_v37, %v180_v51 }
  0x2d   :  { %vm162_vm9 = vc.u32 %v154_v29, %v158_v41  ;;  %v164_v42 = vadd.s32 %v158_v41, %v154_v29  ;;  %v186_v48 = vadd.s32 %v180_v51, %v176_v37  ;;  %v282_v61 = vshrl.u32 %v774_v46, %v856_v60 }
  0x2e   :  { %v163_v59 = vsel %vm162_vm9, 1, %v776_v58  ;;  %v185_v53 = vsel %vm184_vm10, 1, %v776_v58  ;;  %v284_v63 = vshll.u32 %v774_v46, %v841_v36  ;;  %v280_v44 = vor.u32 %v279_v33, %v278_v28 }
  0x2f   :  { %v165_v62 = vadd.s32 %v163_v59, %v157_v34  ;;  %vm166_vm11 = vc.u32 %v164_v42, %v160_v45  ;;  %v187_v3 = vadd.s32 %v185_v53, %v179_v47  ;;  %vm188_vm12 = vc.u32 %v186_v48, %v182_v54 }
  0x30   :  { %v167_v2 = vsel %vm166_vm11, 1, %v776_v58  ;;  %v189_v6 = vsel %vm188_vm12, 1, %v776_v58  ;;  %v283_v11 = vor.u32 %v282_v61, %v281_v57  ;;  %v285_v12 = vshrl.u32 %v775_v55, %v856_v60 }
  0x31   :  { %v169_v5 = vadd.s32 %v167_v2, %v165_v62  ;;  %v909_v13 = vadd.s32 %v186_v48, %v182_v54  ;;  %v191_v14 = vadd.s32 %v189_v6, %v187_v3  ;;  %vm287_vm13 = vcmp.lt.s32.totalorder %v865_v4, 1 }
  0x32   :  { %vm289_vm14 = vcmp.lt.s32.totalorder %v865_v4, 3  ;;  %v286_v46 = vor.u32 %v285_v12, %v284_v63  ;;  %vm288_vm15 = vcmp.lt.s32.totalorder %v865_v4, 2  ;;  %vm290_vm1 = vcmp.lt.s32.totalorder %v865_v4, 4 }
  0x33   :  { %v170_v36 = vadd.s32 %v169_v5, %v159_v43  ;;  %v140_v15 = vsel %vm134_vm8, %v137_v17, %v139_v25  ;;  %v192_v16 = vadd.s32 %v191_v14, %v181_v52  ;;  %v295_v55 = vsel %vm287_vm13, %v890_v26, %v892_v27 }
  0x34   :  { %v296_v18 = vsel %vm290_vm1, %v283_v11, 920167782  ;;  %v299_v21 = vsel %vm287_vm13, %v892_v27, %v280_v44  ;;  %v304_v35 = vand.u32 65535, %v847_v49  ;;  %v300_v23 = vsel %vm290_vm1, %v286_v46, 1326507024 }
  0x35   :  { %v923_v19 = vadd.s32 %v170_v36, %v161_v50  ;;  %v297_v20 = vsel %vm289_vm14, %v280_v44, %v296_v18  ;;  %v193_v17 = vadd.s32 %v192_v16, %v183_v56  ;;  %v305_v24 = vshrl.u32 %v847_v49, 16 }
  0x36   :  { %v298_v22 = vsel %vm288_vm15, %v295_v55, %v297_v20  ;;  %v194_v25 = vmul.u32 %v837_v31, %v140_v15  ;;  %v301_v28 = vsel %vm289_vm14, %v283_v11, %v300_v23  ;;  %v271_v40 = vshrl.u32 %v770_v38, %v856_v60 }
  0x37   :  { %vm196_vm2 = vc.u32 %v923_v19, %v909_v13  ;;  %v328_v29 = vand.u32 65535, %v298_v22  ;;  %v197_v30 = vadd.s32 1, %v193_v17  ;;  %v302_v32 = vsel %vm288_vm15, %v299_v21, %v301_v28 }
  0x38   :  { %v329_v33 = vshrl.u32 %v298_v22, 16  ;;  %v306_v34 = vand.u32 65535, %v302_v32  ;;  %v307_v37 = vshrl.u32 %v302_v32, 16  ;;  %v292_v42 = vsel %vm290_vm1, %v280_v44, 2102212464 }
  0x39   :  { %v198_v39 = vsel %vm196_vm2, %v197_v30, %v193_v17  ;;  %v332_v31 = vmul.u32 %v328_v29, %v305_v24  ;;  %v330_v50 = vmul.u32 %v328_v29, %v304_v35  ;;  %v291_v59 = vsel %vm287_vm13, %v271_v40, %v890_v26 }
  0x3a   :  { %v331_v41 = vmul.u32 %v329_v33, %v304_v35  ;;  %v199_v43 = vadd.s32 %v198_v39, %v194_v25  ;;  %v308_v45 = vmul.u32 %v306_v34, %v304_v35  ;;  %v309_v47 = vmul.u32 %v307_v37, %v304_v35 }
  0x3b   :  { %v310_v51 = vmul.u32 %v306_v34, %v305_v24  ;;  %v311_v56 = vmul.u32 %v307_v37, %v305_v24  ;;  %v333_v38 = vmul.u32 %v329_v33, %v305_v24  ;;  %v336_v60 = vshll.u32 %v332_v31, 16 }
  0x3c   :  { %v334_v52 = vshll.u32 %v331_v41, 16  ;;  %v200_v54 = vadd.s32 536870912, %v199_v43  ;;  %v312_v57 = vshll.u32 %v309_v47, 16  ;;  %v293_v53 = vsel %vm289_vm14, %v892_v27, %v292_v42 }
  0x3d   :  { %v314_v48 = vshll.u32 %v310_v51, 16  ;;  %v313_v26 = vshrl.u32 %v309_v47, 16  ;;  %v335_v11 = vshrl.u32 %v331_v41, 16  ;;  %v315_v36 = vshrl.u32 %v310_v51, 16 }
  0x3e   :  { %v950_v61 = vshrl.u32 %v200_v54, 30  ;;  %vm316_vm3 = vc.u32 %v308_v45, %v312_v57  ;;  %v318_v62 = vadd.s32 %v312_v57, %v308_v45  ;;  %vm338_vm4 = vc.u32 %v330_v50, %v334_v52 }
  0x3f   :  { %v317_v63 = vsel %vm316_vm3, 1, %v776_v58  ;;  %v339_v2 = vsel %vm338_vm4, 1, %v776_v58  ;;  %v340_v3 = vadd.s32 %v334_v52, %v330_v50  ;;  %v337_v15 = vshrl.u32 %v332_v31, 16 }
  0x40   :  { %v202_v44 = vshll.u32 %v950_v61, 30  ;;  %v319_v5 = vadd.s32 %v317_v63, %v311_v56  ;;  %vm320_vm5 = vc.u32 %v318_v62, %v314_v48  ;;  %v341_v12 = vadd.s32 %v339_v2, %v333_v38 }
  0x41   :  { %v321_v6 = vsel %vm320_vm5, 1, %v776_v58  ;;  %vm342_vm6 = vc.u32 %v340_v3, %v336_v60  ;;  %v344_v20 = vadd.s32 %v340_v3, %v336_v60  ;;  %v294_v21 = vsel %vm288_vm15, %v291_v59, %v293_v53 }
  0x42   :  { %v203_v14 = vsub.s32 %v199_v43, %v202_v44  ;;  %v323_v46 = vadd.s32 %v321_v6, %v319_v5  ;;  %v343_v27 = vsel %vm342_vm6, 1, %v776_v58  ;;  %v348_v25 = vmul.u32 %v847_v49, %v294_v21 }
  0x43   :  { %v345_v16 = vadd.s32 %v343_v27, %v341_v12  ;;  %v195_v58 = vadd.s32 %v909_v13, %v923_v19  ;;  %v969_v13 = vshrl.u32 %v65_v0, 7  ;;  %vm103_vm11 = vcmp.lt.s32.totalorder %v815_v7, 0 }
  0x44   :  { %vm204_vm7 = vcmp.lt.s32.totalorder %v203_v14, 0  ;;  %v205_v55 = vsub.s32 0, %v203_v14  ;;  %v324_v18 = vadd.s32 %v323_v46, %v313_v26  ;;  %vm102_vm12 = vcmp.le.f32.partialorder %v820_v9, 0.7853982 }
  0x45   :  { %v346_v35 = vadd.s32 %v345_v16, %v335_v11  ;;  %v78_v42 = vand.u32 1, %v969_v13  ;;  %v225_v48 = vsub.s32 4, %v950_v61  ;;  %vm77_vm13 = vcmp.lt.s32.totalorder %v969_v13, 4  ;;  %v419_v16 = vld.sshfl [vmem:[#allocation1] sm:$0xff pattern:$0x75316420] }
  0x46   :  { %v206_v17 = vsel %vm204_vm7, %v205_v55, %v203_v14  ;;  %v325_v22 = vadd.s32 %v324_v18, %v315_v36  ;;  %vm431_vm2 = vcmask 1043456   ;;  %vm257_vm3 = vcmp.lt.s32.totalorder %v817_v8, 0 }
  0x47   :  { %v207_v23 = vclz %v206_v17  ;;  %v347_v24 = vadd.s32 %v346_v35, %v337_v15  ;;  %vm976_vm14 = vcmp.eq.s32.totalorder %v78_v42, 0  ;;  %v226_v2 = vsel %vm103_vm11, %v225_v48, %v950_v61  ;;  %v421_v35 = vld.sshfl [vmem:[#allocation1 + $0x10] sm:$0xff pattern:$0x75316420] }
  0x48   :  { %vm350_vm8 = vc.u32 %v325_v22, %v344_v20  ;;  %v349_v63 = vadd.s32 %v344_v20, %v325_v22  ;;  %vm988_vm1 = vmand %vm77_vm13, %vm976_vm14  ;;  %v228_v36 = vsel %vm102_vm12, 0, %v226_v2  ;;  %v422_v17 = vld.sshfl [vmem:[#allocation1 + $0x18] sm:$0xff pattern:$0x75316420]  ;;  %vm256_vm4 = vcmp.le.f32.partialorder %v823_v10, 0.7853982 }
  0x49   :  { %v641_v28 = vadd.s32 4294967294, %v207_v23  ;;  %v351_v29 = vadd.s32 1, %v347_v24  ;;  %v245_v22 = vand.u32 3, %v228_v36  ;;  %v427_v23 = vsel %vm988_vm1, %v419_v16, 0.0 }
  0x4a   :  { %vm244_vm5 = vweird.f32 %v815_v7 }
  0x4b   :  { %vm642_vm9 = vcmp.lt.s32.totalorder %v641_v28, 0  ;;  %v352_v30 = vsel %vm350_vm8, %v351_v29, %v347_v24  ;;  %v429_v24 = vsel %vm988_vm1, %v421_v35, 0.0  ;;  %vm246_vm6 = vcmp.lt.s32.totalorder %v245_v22, 2 }
  0x4c   :  { %v210_v32 = vsel %vm642_vm9, 0, %v641_v28  ;;  %v353_v33 = vadd.s32 %v352_v30, %v348_v25  ;;  %vm250_vm7 = vcmp.eq.s32.totalorder %v245_v22, 2  ;;  %vm247_vm8 = vcmp.eq.s32.totalorder %v245_v22, 0 }
  0x4d   :  { %v211_v34 = vsub.s32 32, %v210_v32  ;;  %v212_v4 = vshll.u32 %v203_v14, %v210_v32  ;;  %v215_v37 = vsub.s32 4294967266, %v210_v32  ;;  %v420_v14 = vld.sshfl [vmem:[#allocation1 + $0x8] sm:$0xff pattern:$0x75316420]  ;;  %v432_v32 = vsel %vm431_vm2, %v427_v23, 0.0 }
  0x4e   :  { %v354_v39 = vadd.s32 536870912, %v353_v33  ;;  %v428_v55 = vsel %vm988_vm1, %v420_v14, 0.0  ;;  %vm467_vm9 = vcmask 1040384  }
  0x4f   :  { %v213_v40 = vshrl.u32 %v195_v58, %v211_v34  ;;  %v216_v41 = vadd.s32 127, %v215_v37  ;;  %v430_v58 = vsel %vm988_vm1, %v422_v17, 0.0  ;;  %v446_v34 = vsel %vm431_vm2, %v429_v24, 0.0 }
  0x50   :  { %v965_v31 = vshrl.u32 %v354_v39, 30  ;;  %v433_v39 = vrot.slane %v432_v32, 4 }
  0x51   :  { %v214_v43 = vor.u32 %v213_v40, %v212_v4  ;;  %v217_v49 = vshll.u32 %v216_v41, 23 }
  0x52   :  { %v356_v45 = vshll.u32 %v965_v31, 30 }
  0x53   :  { %v218_v47 = vor.u32 4788187, %v217_v49  ;;  %v221_v50 = vcvt.s32.f32 %v214_v43  ;;  %v447_v43 = vrot.slane %v446_v34, 4  ;;  %v453_v49 = vsel %vm431_vm2, %v430_v58, 0.0 }
  0x54   :  { %v357_v19 = vsub.s32 %v353_v33, %v356_v45  ;;  %v439_v33 = vsel %vm431_vm2, %v428_v55, 0.0 }
  0x55   :  { %v219_v51 = vand.u32 2147483647, %v218_v47  ;;  %v440_v40 = vrot.slane %v439_v33, 4 }
  0x56   :  { %vm358_vm10 = vcmp.lt.s32.totalorder %v357_v19, 0  ;;  %v359_v52 = vsub.s32 0, %v357_v19 }
  0x57   :  { %v222_v54 = vmul.f32 %v221_v50, %v219_v51  ;;  %v434_v50 = vadd.f32 %v433_v39, %v432_v32 }
  0x58   :  { %v360_v56 = vsel %vm358_vm10, %v359_v52, %v357_v19  ;;  %v448_v52 = vadd.f32 %v447_v43, %v446_v34  ;;  %vm469_vm10 = vcmask 1042434   ;;  %v411_v34 = vld [vmem:[#allocation2] sm:$0xf] }
  0x59   :  { %v223_v57 = vxor.u32 2147483648, %v222_v54  ;;  %v361_v59 = vclz %v360_v56 }
  0x5b   :  { %v224_v38 = vsel %vm103_vm11, %v223_v57, %v222_v54  ;;  %v644_v60 = vadd.s32 4294967294, %v361_v59  ;;  %v454_v54 = vrot.slane %v453_v49, 4  ;;  %v435_v57 = vrot.slane %v434_v50, 2 }
  0x5c   :  { %v227_v62 = vsel %vm102_vm12, %v815_v7, %v224_v38  ;;  %v449_v38 = vrot.slane %v448_v52, 2  ;;  %vm471_vm11 = vcmask 1041408   ;;  %vm777_vm12 = vmmov 1  }
  0x5d   :  { %v229_v53 = vmul.f32 %v227_v62, %v227_v62  ;;  %vm645_vm15 = vcmp.lt.s32.totalorder %v644_v60, 0  ;;  %v436_v2 = vadd.f32 %v435_v57, %v434_v50 }
  0x5e   :  { %v364_v3 = vsel %vm645_vm15, 0, %v644_v60  ;;  %v455_v60 = vadd.f32 %v454_v54, %v453_v49  ;;  %vm81_vm15 = vmxor %vm976_vm14, %vm777_vm12 }
  0x5f   :  { %v230_v26 = vmul.f32 -0.001358992, %v229_v53  ;;  %v237_v5 = vmul.f32 -0.00019511016, %v229_v53  ;;  %v365_v6 = vsub.s32 32, %v364_v3  ;;  %v366_v11 = vshll.u32 %v357_v19, %v364_v3  ;;  %vm1030_vm1 = vmand %vm77_vm13, %vm81_vm15 }
  0x60   :  { %v369_v12 = vsub.s32 4294967266, %v364_v3  ;;  %v441_v19 = vadd.f32 %v440_v40, %v439_v33 }
  0x61   :  { %v231_v46 = vadd.f32 0.041655596, %v230_v26  ;;  %v238_v61 = vadd.f32 0.008332121, %v237_v5  ;;  %v367_v27 = vshrl.u32 %v349_v63, %v365_v6  ;;  %v379_v26 = vsub.s32 4, %v965_v31 }
  0x62   :  { %v370_v15 = vadd.s32 127, %v369_v12  ;;  %v442_v59 = vrot.slane %v441_v19, 2  ;;  %v450_v5 = vadd.f32 %v449_v38, %v448_v52  ;;  %v456_v6 = vrot.slane %v455_v60, 2 }
  0x63   :  { %v232_v18 = vmul.f32 %v231_v46, %v229_v53  ;;  %v239_v20 = vmul.f32 %v238_v61, %v229_v53  ;;  %v368_v21 = vor.u32 %v367_v27, %v366_v11  ;;  %v437_v12 = vrot.slane %v436_v2, 1 }
  0x64   :  { %v371_v9 = vshll.u32 %v370_v15, 23  ;;  %v443_v3 = vadd.f32 %v442_v59, %v441_v19  ;;  %v451_v61 = vrot.slane %v450_v5, 1  ;;  %v457_v27 = vadd.f32 %v456_v6, %v455_v60 }
  0x65   :  { %v233_v25 = vadd.f32 -0.4999988, %v232_v18  ;;  %v240_v28 = vadd.f32 -0.16666654, %v239_v20  ;;  %v375_v29 = vcvt.s32.f32 %v368_v21  ;;  %v380_v35 = vsel %vm257_vm3, %v379_v26, %v965_v31 }
  0x66   :  { %v372_v30 = vor.u32 4788187, %v371_v9  ;;  %v444_v14 = vrot.slane %v443_v3, 1  ;;  %v452_v21 = vadd.f32 %v451_v61, %v450_v5  ;;  %v438_v17 = vadd.f32 %v437_v12, %v436_v2 }
  0x67   :  { %v234_v4 = vmul.f32 %v233_v25, %v229_v53  ;;  %v241_v37 = vmul.f32 %v240_v28, %v229_v53  ;;  %v458_v9 = vrot.slane %v457_v27, 1  ;;  %v382_v7 = vsel %vm256_vm4, 0, %v380_v35 }
  0x68   :  { %v373_v41 = vand.u32 2147483647, %v372_v30  ;;  %v445_v16 = vadd.f32 %v444_v14, %v443_v3  ;;  %v465_v28 = vrot.slane %v452_v21, 6 }
  0x69   :  { %v235_v45 = vadd.f32 1.0, %v234_v4  ;;  %v242_v47 = vadd.f32 1.0, %v241_v37  ;;  %v459_v25 = vadd.f32 %v458_v9, %v457_v27  ;;  %v399_v4 = vand.u32 3, %v382_v7 }
  0x6a   :  { %v376_v51 = vmul.f32 %v375_v29, %v373_v41  ;;  %v464_v23 = vrot.slane %v445_v16, 7 }
  0x6b   :  { %v243_v42 = vmul.f32 %v242_v47, %v227_v62  ;;  %v251_v56 = vxor.u32 2147483648, %v235_v45  ;;  %v466_v30 = vrot.slane %v459_v25, 5  ;;  %vm404_vm14 = vcmp.eq.s32.totalorder %v399_v4, 2 }
  0x6c   :  { %v377_v48 = vxor.u32 2147483648, %v376_v51  ;;  %v468_v32 = vsel %vm467_vm9, %v438_v17, %v464_v23  ;;  %vm401_vm13 = vcmp.eq.s32.totalorder %v399_v4, 0 }
  0x6d   :  { %v248_v53 = vxor.u32 2147483648, %v243_v42  ;;  %v252_v63 = vsel %vm250_vm7, %v251_v56, %v243_v42  ;;  %v470_v37 = vsel %vm469_vm10, %v465_v28, %v466_v30 }
  0x6e   :  { %v378_v44 = vsel %vm257_vm3, %v377_v48, %v376_v51  ;;  %v472_v40 = vsel %vm471_vm11, %v468_v32, %v470_v37  ;;  %vm400_vm3 = vcmp.lt.s32.totalorder %v399_v4, 2 }
  0x6f   :  { %v249_v11 = vsel %vm247_vm8, %v235_v45, %v248_v53  ;;  %v381_v62 = vsel %vm256_vm4, %v817_v8, %v378_v44  ;;  %v474_v43 = vadd.f32 %v472_v40, %v411_v34  ;;  %vm398_vm4 = vweird.f32 %v817_v8 }
  0x70   :  { %v253_v36 = vsel %vm246_vm6, %v249_v11, %v252_v63  ;;  %v383_v46 = vmul.f32 %v381_v62, %v381_v62 }
  0x71   :  { %v254_v15 = vsel %vm244_vm5, nan, %v253_v36  ;;  %479 = vst.msk [vmem:[#allocation2] sm:$0xf] %vm807_vm0, %v474_v43  ;;  %v480_v43 = vld [vmem:[#allocation3] sm:$0xf] }
  0x72   :  { %v384_v55 = vmul.f32 -0.001358992, %v383_v46  ;;  %v391_v18 = vmul.f32 -0.00019511016, %v383_v46  ;;  %v409_v20 = vsub.f32 1.0, %v254_v15 }
  0x74   :  { %v385_v22 = vadd.f32 0.041655596, %v384_v55  ;;  %v392_v24 = vadd.f32 0.008332121, %v391_v18  ;;  %485 = vst [vmem:[#allocation1] ss:$2 sm:$0xff] %v409_v20 }
  0x76   :  { %v386_v29 = vmul.f32 %v385_v22, %v383_v46  ;;  %v393_v58 = vmul.f32 %v392_v24, %v383_v46 }
  0x78   :  { %v387_v31 = vadd.f32 -0.4999988, %v386_v29  ;;  %v394_v33 = vadd.f32 -0.16666654, %v393_v58  ;;  %v544_v63 = vld [vmem:[#allocation2] sm:$0xf] }
  0x79   :  { %v546_v3 = vperm.slane %v544_v63, 0  ;;  %v547_v44 = vperm.slane %v544_v63, 1  ;;  %v548_v26 = vperm.slane %v544_v63, 2  ;;  %v549_v5 = vperm.slane %v544_v63, 3 }
  0x7a   :  { %v388_v39 = vmul.f32 %v387_v31, %v383_v46  ;;  %v395_v10 = vmul.f32 %v394_v33, %v383_v46 }
  0x7b   :  { %v488_v45 = vld.sshfl [vmem:[#allocation1] sm:$0xff pattern:$0x75316420]  ;;  %v489_v47 = vld.sshfl [vmem:[#allocation1 + $0x8] sm:$0xff pattern:$0x75316420] }
  0x7c   :  { %v389_v49 = vadd.f32 1.0, %v388_v39  ;;  %v396_v0 = vadd.f32 1.0, %v395_v10  ;;  %v496_v51 = vsel %vm1030_vm1, %v488_v45, 0.0  ;;  %v497_v13 = vsel %vm1030_vm1, %v489_v47, 0.0 }
  0x7d   :  { %v507_v52 = vsel %vm431_vm2, %v497_v13, 0.0  ;;  %v500_v57 = vsel %vm431_vm2, %v496_v51, 0.0  ;;  %v554_v6 = vsel %vm467_vm9, %v546_v3, 0.0  ;;  %v555_v11 = vsel %vm467_vm9, %v547_v44, 0.0 }
  0x7e   :  { %v397_v50 = vmul.f32 %v396_v0, %v381_v62  ;;  %v405_v19 = vxor.u32 2147483648, %v389_v49  ;;  %v508_v56 = vrot.slane %v507_v52, 4  ;;  %v501_v60 = vrot.slane %v500_v57, 4 }
  0x7f   :  { %v557_v8 = vsel %vm467_vm9, %v548_v26, 0.0  ;;  %v556_v62 = vadd.f32 %v555_v11, %v554_v6  ;;  %v559_v14 = vsel %vm467_vm9, %v549_v5, 0.0 }
  0x80   :  { %v402_v54 = vxor.u32 2147483648, %v397_v50  ;;  %v406_v42 = vsel %vm404_vm14, %v405_v19, %v397_v50  ;;  %v509_v53 = vadd.f32 %v508_v56, %v507_v52  ;;  %v502_v12 = vadd.f32 %v501_v60, %v500_v57 }
  0x81   :  { %v558_v46 = vadd.f32 %v557_v8, %v556_v62 }
  0x82   :  { %v403_v59 = vsel %vm401_vm13, %v389_v49, %v402_v54  ;;  %v510_v36 = vrot.slane %v509_v53, 2  ;;  %v503_v27 = vrot.slane %v502_v12, 2 }
  0x83   :  { %v407_v48 = vsel %vm400_vm3, %v403_v59, %v406_v42  ;;  %v560_v61 = vadd.f32 %v559_v14, %v558_v46 }
  0x84   :  { %v408_v38 = vsel %vm398_vm4, nan, %v407_v48  ;;  %v511_v15 = vadd.f32 %v510_v36, %v509_v53  ;;  %v504_v23 = vadd.f32 %v503_v27, %v502_v12 }
  0x85   :  { %v410_v2 = vsub.f32 1.0, %v408_v38  ;;  %561 = vadd.xlane.f32.xlu0 %v560_v61 }
  0x86   :  { %v512_v22 = vrot.slane %v511_v15, 1  ;;  %v505_v28 = vrot.slane %v504_v23, 1 }
  0x87   :  { %487 = vst [vmem:[#allocation1 + $0x10] ss:$2 sm:$0xff] %v410_v2 }
  0x88   :  { %v513_v7 = vadd.f32 %v512_v22, %v511_v15  ;;  %v506_v31 = vadd.f32 %v505_v28, %v504_v23 }
  0x8a   :  { %v532_v4 = vrot.slane %v513_v7, 7 }
  0x8c   :  { %v535_v41 = vsel %vm467_vm9, %v506_v31, %v532_v4 }
  0x8e   :  { %v490_v16 = vld.sshfl [vmem:[#allocation1 + $0x10] sm:$0xff pattern:$0x75316420]  ;;  %v491_v55 = vld.sshfl [vmem:[#allocation1 + $0x18] sm:$0xff pattern:$0x75316420] }
  0x8f   :  { %v498_v18 = vsel %vm1030_vm1, %v490_v16, 0.0  ;;  %v499_v20 = vsel %vm1030_vm1, %v491_v55, 0.0 }
  0x90   :  { %v514_v21 = vsel %vm431_vm2, %v498_v18, 0.0  ;;  %v521_v35 = vsel %vm431_vm2, %v499_v20, 0.0 }
  0x91   :  { %v515_v17 = vrot.slane %v514_v21, 4  ;;  %v522_v9 = vrot.slane %v521_v35, 4 }
  0x93   :  { %v516_v24 = vadd.f32 %v515_v17, %v514_v21  ;;  %v523_v25 = vadd.f32 %v522_v9, %v521_v35 }
  0x95   :  { %v517_v29 = vrot.slane %v516_v24, 2  ;;  %v524_v58 = vrot.slane %v523_v25, 2 }
  0x97   :  { %v518_v30 = vadd.f32 %v517_v29, %v516_v24  ;;  %v525_v32 = vadd.f32 %v524_v58, %v523_v25 }
  0x99   :  { %v519_v33 = vrot.slane %v518_v30, 1  ;;  %v526_v34 = vrot.slane %v525_v32, 1 }
  0x9b   :  { %v520_v37 = vadd.f32 %v519_v33, %v518_v30  ;;  %v527_v39 = vadd.f32 %v526_v34, %v525_v32 }
  0x9d   :  { %v533_v10 = vrot.slane %v520_v37, 6  ;;  %v534_v40 = vrot.slane %v527_v39, 5 }
  0x9f   :  { %v536_v49 = vsel %vm469_vm10, %v533_v10, %v534_v40 }
  0xa0   :  { %v537_v0 = vsel %vm471_vm11, %v535_v41, %v536_v49 }
  0xa1   :  { %v539_v45 = vadd.f32 %v537_v0, %v480_v43 }
  0xa3   :  { %540 = vst.msk [vmem:[#allocation3] sm:$0xf] %vm807_vm0, %v539_v45 }
  0xaa   :  { %v572_v47 = vld [vmem:[#allocation3] sm:$0xf] }
  0xab   :  { %v574_v50 = vperm.slane %v572_v47, 0  ;;  %v575_v19 = vperm.slane %v572_v47, 1  ;;  %v576_v51 = vperm.slane %v572_v47, 2  ;;  %v577_v13 = vperm.slane %v572_v47, 3 }
  0xad   :  { %v582_v52 = vsel %vm467_vm9, %v574_v50, 0.0  ;;  %v583_v54 = vsel %vm467_vm9, %v575_v19, 0.0  ;;  %v585_v42 = vsel %vm467_vm9, %v576_v51, 0.0  ;;  %v587_v57 = vsel %vm467_vm9, %v577_v13, 0.0 }
  0xae   :  { %v584_v56 = vadd.f32 %v583_v54, %v582_v52 }
  0xb0   :  { %v586_v59 = vadd.f32 %v585_v42, %v584_v56 }
  0xb2   :  { %v588_v48 = vadd.f32 %v587_v57, %v586_v59 }
  0xb4   :  { %589 = vadd.xlane.f32.xlu0 %v588_v48 }
  0xf8   :  { %v562_v38 = vpop.xlane.xlu0 %561 }
  0xf9   :  { %v563_v1 = vrot.slane %v562_v38, 4 }
  0xfb   :  { %v564_v60 = vadd.f32 %v563_v1, %v562_v38 }
  0xfd   :  { %v565_v53 = vrot.slane %v564_v60, 2 }
  0xff   :  { %v566_v63 = vadd.f32 %v565_v53, %v564_v60 }
 0x101   :  { %v567_v2 = vrot.slane %v566_v63, 1 }
 0x103   :  { %v568_v3 = vadd.f32 %v567_v2, %v566_v63 }
 0x105   :  { %646 = vpush %v568_v3 }
 0x127   :  { %v590_v44 = vpop.xlane.xlu0 %589 }
 0x128   :  { %v591_v26 = vrot.slane %v590_v44, 4 }
 0x12a   :  { %v592_v5 = vadd.f32 %v591_v26, %v590_v44 }
 0x12c   :  { %v593_v6 = vrot.slane %v592_v5, 2 }
 0x12e   :  { %v594_v11 = vadd.f32 %v593_v6, %v592_v5 }
 0x130   :  { %v595_v8 = vrot.slane %v594_v11, 1 }
 0x132   :  { %v596_v62 = vadd.f32 %v595_v8, %v594_v11 }
 0x134   :  { %648 = vpush %v596_v62 }
 0x136   :  { %s647_s25 = spop %646 }
 0x137   :  { %v570_v12 = vstv %s647_s25 }
 0x138   :  { %571 = vst [vmem:[#allocation9] sm:$0x1] %v570_v12 }
 0x139   :  { %610 = dma.vmem_to_hbm [thread:$0]  %s606_s1, 16, %s608_s24, [#allocation6]  }
 0x165   :  { %s649_s4 = spop %648 }
 0x166   :  { %v598_v14 = vstv %s649_s4 }
 0x167   :  { %599 = vst [vmem:[#allocation10] sm:$0x1] %v598_v14 }
 0x168   :  { %621 = dma.vmem_to_hbm [thread:$0]  %s617_s27, 16, %s619_s30, [#allocation11]  }
 0x169   :  { %763 = dma.done.wait [#allocation6], 16  }
 0x16a   :  { %764 = vsyncadd [#allocation6], 4294967280 }
 0x16b   :  { %765 = dma.done.wait [#allocation11], 16  }
 0x16c   :  { %766 = vsyncadd [#allocation11], 4294967280 }
 0x16d   :  { %630 = vsyncpa [#allocation5], 1 }
 0x16e   :  { %631 = vsyncpa [#allocation8], 1 }
 0x16f   :  { %632 = vsyncpa [#allocation6], 1 }
 0x170   :  { %633 = vsyncpa [#allocation11], 1 }

</bundles_post_ra>
